<compile_context>
chip_gen: v7x
topology: tpu7x:2x2x1
jax: 0.10.0
libtpu: 0.0.40
codegen_flags: <defaults>
</compile_context>

<pallas_src>
import jax
import jax.numpy as jnp
from jax.experimental import pallas as pl
from jax.experimental.pallas import tpu as pltpu


def _round_up(x, m):
    return (x + m - 1) // m * m


def fusion_kernel(a_ref, b_ref, wa_ref, wb_ref, wab_ref, bias_ref, o_ref):
    a = a_ref[...]
    b = b_ref[...]
    # y = [a, b, a*b, a-b] @ W^T + bias with the weight pre-folded:
    #   Wa = W1 + W4, Wb = W2 - W4, Wab = W3
    y = jnp.dot(a, wa_ref[...], preferred_element_type=jnp.float32)
    y = y + jnp.dot(b, wb_ref[...], preferred_element_type=jnp.float32)
    y = y + jnp.dot(a * b, wab_ref[...], preferred_element_type=jnp.float32)
    y = y + bias_ref[...]  # (1, n_pad) broadcasts over rows, f32
    o_ref[...] = jnp.tanh(y).astype(o_ref.dtype)


def prepare_fusion_params(weight, bias, *, lane_multiple=128):
    """Fold the PyTorch Linear(4*hd, hd) params once, outside the hot path.

    weight: (hd, 4*hd) (PyTorch layout), bias: (hd,)
    Returns Wa, Wb, Wab of shape (hd, n_pad) and bias2 of shape (1, n_pad),
    where n_pad = round_up(hd, 128) so output stores are lane-dense.
    """
    hd = weight.shape[0]
    assert weight.shape == (hd, 4 * hd)
    w_t = weight.T  # (4*hd, hd); W^T rows blocked per concat segment
    w1 = w_t[0 * hd:1 * hd, :]
    w2 = w_t[1 * hd:2 * hd, :]
    w3 = w_t[2 * hd:3 * hd, :]
    w4 = w_t[3 * hd:4 * hd, :]
    wa = w1 + w4          # multiplies a
    wb = w2 - w4          # multiplies b
    wab = w3              # multiplies a*b

    n_pad = _round_up(hd, lane_multiple)
    if n_pad != hd:
        pad = ((0, 0), (0, n_pad - hd))
        wa = jnp.pad(wa, pad)
        wb = jnp.pad(wb, pad)
        wab = jnp.pad(wab, pad)
        bias = jnp.pad(bias, (0, n_pad - hd))
    bias2 = bias.reshape(1, n_pad)
    return wa, wb, wab, bias2


def simple_fusion_layer_prepped(a, b, wa, wb, wab, bias2, *, block_m=512):
    """Run the fused layer given pre-folded params (see prepare_fusion_params)."""
    assert a.shape == b.shape
    *lead, hd = a.shape
    M = 1
    for d in lead:
        M *= d
    n_pad = wa.shape[1]

    a2 = a.reshape(M, hd)
    b2 = b.reshape(M, hd)

    # Row-tile size: multiple of 8 sublanes; pad M so the grid divides evenly.
    tm = block_m if M >= block_m else _round_up(M, 8)
    m_pad = _round_up(M, tm)
    if m_pad != M:
        a2 = jnp.pad(a2, ((0, m_pad - M), (0, 0)))
        b2 = jnp.pad(b2, ((0, m_pad - M), (0, 0)))

    in_bytes = a2.dtype.itemsize
    w_bytes = wa.dtype.itemsize
    out_bytes = a.dtype.itemsize
    vmem_est = (
        2 * 3 * hd * n_pad * w_bytes        # folded weights (double-buffered)
        + 2 * n_pad * w_bytes               # bias
        + 2 * 2 * tm * hd * in_bytes        # a, b tiles (double-buffered)
        + 2 * tm * n_pad * out_bytes        # out tile (double-buffered)
        + 2 * tm * n_pad * 4                # f32 intermediate headroom
    )
    # Conservative clamp so it is valid on v5e/v6e (128 MiB) and v7x (64 MiB).
    vmem_limit = int(min(max(2 * vmem_est, 32 * 2**20), 48 * 2**20))

    grid = (m_pad // tm,)
    out = pl.pallas_call(
        fusion_kernel,
        out_shape=jax.ShapeDtypeStruct((m_pad, n_pad), a.dtype),
        grid=grid,
        in_specs=[
            pl.BlockSpec((tm, hd), lambda i: (i, 0)),       # a tile
            pl.BlockSpec((tm, hd), lambda i: (i, 0)),       # b tile
            pl.BlockSpec((hd, n_pad), lambda i: (0, 0)),    # Wa (resident)
            pl.BlockSpec((hd, n_pad), lambda i: (0, 0)),    # Wb (resident)
            pl.BlockSpec((hd, n_pad), lambda i: (0, 0)),    # Wab (resident)
            pl.BlockSpec((1, n_pad), lambda i: (0, 0)),     # bias (resident)
        ],
        out_specs=pl.BlockSpec((tm, n_pad), lambda i: (i, 0)),
        compiler_params=pltpu.CompilerParams(
            dimension_semantics=("parallel",),
            vmem_limit_bytes=vmem_limit,
        ),
    )(a2, b2, wa, wb, wab, bias2)

    out = out[:M, :hd]
    return out.reshape(*lead, hd)


def simple_fusion_layer(a, b, weight, bias, *, block_m=512):
    """a, b: (batch, seq, hd); weight: (hd, 4*hd) (PyTorch layout); bias: (hd,)."""
    wa, wb, wab, bias2 = prepare_fusion_params(weight, bias)
    return simple_fusion_layer_prepped(a, b, wa, wb, wab, bias2, block_m=block_m)


if __name__ == "__main__":
    batch, seq, hd = 2, 8, 32

    key = jax.random.PRNGKey(0)
    k_a, k_b, k_w, k_bias = jax.random.split(key, 4)

    a = jax.random.normal(k_a, (batch, seq, hd), dtype=jnp.float32)
    b = jax.random.normal(k_b, (batch, seq, hd), dtype=jnp.float32)

    # PyTorch nn.Linear(4*hd, hd) parameter shapes: weight (hd, 4*hd), bias (hd,)
    bound = 1.0 / jnp.sqrt(4.0 * hd)
    weight = jax.random.uniform(k_w, (hd, 4 * hd), minval=-bound, maxval=bound,
                                dtype=jnp.float32)
    bias = jax.random.uniform(k_bias, (hd,), minval=-bound, maxval=bound,
                              dtype=jnp.float32)

    out = simple_fusion_layer(a, b, weight, bias)
    out = jax.block_until_ready(out)

    # Reference check in plain JAX (matches the PyTorch forward).
    x_ref = jnp.concatenate([a, b, a * b, a - b], axis=-1)
    y_ref = jnp.tanh(x_ref @ weight.T + bias)
    assert out.shape == (batch, seq, hd)
    assert jnp.allclose(out, y_ref, atol=1e-5, rtol=1e-5)

    print("KERNEL_OK")
</pallas_src>

<mosaic_0001>
module attributes {stable_mosaic.version = 11 : i64} {
  func.func @fusion_kernel(%arg0: i32, %arg1: memref<16x32xf32, #tpu.memory_space<vmem>>, %arg2: memref<16x32xf32, #tpu.memory_space<vmem>>, %arg3: memref<32x128xf32, #tpu.memory_space<vmem>>, %arg4: memref<32x128xf32, #tpu.memory_space<vmem>>, %arg5: memref<32x128xf32, #tpu.memory_space<vmem>>, %arg6: memref<1x128xf32, #tpu.memory_space<vmem>>, %arg7: memref<16x128xf32, #tpu.memory_space<vmem>>) attributes {dimension_semantics = [#tpu.dimension_semantics<parallel>], iteration_bounds = array<i64: 1>, scalar_prefetch = 0 : i64, scratch_operands = 0 : i64, tpu.core_type = #tpu.core_type<tc>, window_params = [{transform_indices = @transform_0, window_bounds = array<i64: 16, 32>}, {transform_indices = @transform_1, window_bounds = array<i64: 16, 32>}, {pipeline_mode = #tpu.pipeline_mode<synchronous>, transform_indices = @transform_2, window_bounds = array<i64: 32, 128>}, {pipeline_mode = #tpu.pipeline_mode<synchronous>, transform_indices = @transform_3, window_bounds = array<i64: 32, 128>}, {pipeline_mode = #tpu.pipeline_mode<synchronous>, transform_indices = @transform_4, window_bounds = array<i64: 32, 128>}, {pipeline_mode = #tpu.pipeline_mode<synchronous>, transform_indices = @transform_5, window_bounds = array<i64: 1, 128>}, {transform_indices = @transform_6, window_bounds = array<i64: 16, 128>}]} {
    %c0 = arith.constant 0 : index
    %c0_0 = arith.constant 0 : index
    %0 = vector.load %arg1[%c0, %c0_0] : memref<16x32xf32, #tpu.memory_space<vmem>>, vector<16x32xf32>
    %c0_1 = arith.constant 0 : index
    %c0_2 = arith.constant 0 : index
    %1 = vector.load %arg2[%c0_1, %c0_2] : memref<16x32xf32, #tpu.memory_space<vmem>>, vector<16x32xf32>
    %c0_3 = arith.constant 0 : index
    %c0_4 = arith.constant 0 : index
    %2 = vector.load %arg3[%c0_3, %c0_4] : memref<32x128xf32, #tpu.memory_space<vmem>>, vector<32x128xf32>
    %cst = arith.constant dense<0.000000e+00> : vector<16x128xf32>
    %3 = tpu.matmul %0, %2, %cst {dimension_numbers = #tpu.dot_dimension_numbers<[1], [0], [0], [1], [0, 0, 1, 1], [], []>} : vector<16x32xf32>, vector<32x128xf32>, vector<16x128xf32> -> vector<16x128xf32>
    %c0_5 = arith.constant 0 : index
    %c0_6 = arith.constant 0 : index
    %4 = vector.load %arg4[%c0_5, %c0_6] : memref<32x128xf32, #tpu.memory_space<vmem>>, vector<32x128xf32>
    %cst_7 = arith.constant dense<0.000000e+00> : vector<16x128xf32>
    %5 = tpu.matmul %1, %4, %cst_7 {dimension_numbers = #tpu.dot_dimension_numbers<[1], [0], [0], [1], [0, 0, 1, 1], [], []>} : vector<16x32xf32>, vector<32x128xf32>, vector<16x128xf32> -> vector<16x128xf32>
    %6 = arith.addf %3, %5 : vector<16x128xf32>
    %7 = arith.mulf %0, %1 : vector<16x32xf32>
    %c0_8 = arith.constant 0 : index
    %c0_9 = arith.constant 0 : index
    %8 = vector.load %arg5[%c0_8, %c0_9] : memref<32x128xf32, #tpu.memory_space<vmem>>, vector<32x128xf32>
    %cst_10 = arith.constant dense<0.000000e+00> : vector<16x128xf32>
    %9 = tpu.matmul %7, %8, %cst_10 {dimension_numbers = #tpu.dot_dimension_numbers<[1], [0], [0], [1], [0, 0, 1, 1], [], []>} : vector<16x32xf32>, vector<32x128xf32>, vector<16x128xf32> -> vector<16x128xf32>
    %10 = arith.addf %6, %9 : vector<16x128xf32>
    %c0_11 = arith.constant 0 : index
    %c0_12 = arith.constant 0 : index
    %11 = vector.load %arg6[%c0_11, %c0_12] : memref<1x128xf32, #tpu.memory_space<vmem>>, vector<1x128xf32>
    %12 = vector.broadcast %11 : vector<1x128xf32> to vector<16x128xf32>
    %13 = arith.addf %10, %12 : vector<16x128xf32>
    %14 = math.tanh %13 : vector<16x128xf32>
    %c0_13 = arith.constant 0 : index
    %c0_14 = arith.constant 0 : index
    %15 = vector.load %arg7[%c0_13, %c0_14] : memref<16x128xf32, #tpu.memory_space<vmem>>, vector<16x128xf32>
    tpu.vector_store %arg7[%c0_13, %c0_14], %14 {strides = array<i32>} : memref<16x128xf32, #tpu.memory_space<vmem>>, vector<16x128xf32>,
    return
  }
  func.func @transform_0(%arg0: i32) -> (i32, i32) {
    %c0_i32 = arith.constant 0 : i32
    %c0_i32_0 = arith.constant 0 : i32
    return %arg0, %c0_i32 : i32, i32
  }
  func.func @transform_1(%arg0: i32) -> (i32, i32) {
    %c0_i32 = arith.constant 0 : i32
    %c0_i32_0 = arith.constant 0 : i32
    return %arg0, %c0_i32 : i32, i32
  }
  func.func @transform_2(%arg0: i32) -> (i32, i32) {
    %c0_i32 = arith.constant 0 : i32
    %c0_i32_0 = arith.constant 0 : i32
    %c0_i32_1 = arith.constant 0 : i32
    return %c0_i32, %c0_i32_0 : i32, i32
  }
  func.func @transform_3(%arg0: i32) -> (i32, i32) {
    %c0_i32 = arith.constant 0 : i32
    %c0_i32_0 = arith.constant 0 : i32
    %c0_i32_1 = arith.constant 0 : i32
    return %c0_i32, %c0_i32_0 : i32, i32
  }
  func.func @transform_4(%arg0: i32) -> (i32, i32) {
    %c0_i32 = arith.constant 0 : i32
    %c0_i32_0 = arith.constant 0 : i32
    %c0_i32_1 = arith.constant 0 : i32
    return %c0_i32, %c0_i32_0 : i32, i32
  }
  func.func @transform_5(%arg0: i32) -> (i32, i32) {
    %c0_i32 = arith.constant 0 : i32
    %c0_i32_0 = arith.constant 0 : i32
    %c0_i32_1 = arith.constant 0 : i32
    return %c0_i32, %c0_i32_0 : i32, i32
  }
  func.func @transform_6(%arg0: i32) -> (i32, i32) {
    %c0_i32 = arith.constant 0 : i32
    %c0_i32_0 = arith.constant 0 : i32
    return %arg0, %c0_i32 : i32, i32
  }
}

</mosaic_0001>

<bundles_post_ra>
// kernel: tpu_custom_call.1
= control target key start
LH: loop header
LB: loop body
LE: loop exit
PB: predicated region body
PF: predicated region fallthrough
CT: control target
= control target key end

     0   :  { %11 = vsyncpa [#allocation3], 0  ;;  %s782_s0 = inlined_call_operand.hbm [shape: f32[16,32], index: 0, kind: input, shape index: {}]   ;;  %s783_s1 = inlined_call_operand.hbm [shape: f32[16,32], index: 1, kind: input, shape index: {}]   ;;  %s784_s2 = inlined_call_operand.hbm [shape: f32[32,128], index: 2, kind: input, shape index: {}]   ;;  %s785_s3 = inlined_call_operand.hbm [shape: f32[32,128], index: 3, kind: input, shape index: {}]   ;;  %s786_s4 = inlined_call_operand.hbm [shape: f32[32,128], index: 4, kind: input, shape index: {}]   ;;  %s787_s5 = inlined_call_operand.vmem [shape: f32[1,128], index: 5, kind: input, shape index: {}]   ;;  %s788_s6 = inlined_call_operand.hbm [shape: f32[16,128], index: 6, kind: output, shape index: {}]  }
   0x1   :  { %12 = vsyncpa [#allocation6], 0 }
   0x2   :  { %13 = vsyncpa [#allocation9], 0 }
   0x3   :  { %14 = vsyncpa [#allocation4], 0  ;;  %s626_s21 = smov [#allocation5]   ;;  %s627_s23 = smov [#allocation8]  }
   0x4   :  { %s32_s22 = sshll.u32 %s626_s21, 4  ;;  %s56_s24 = sshll.u32 %s627_s23, 4  ;;  %s33_s22 = int_to_ptr.vmem [resolvable:$true] %s32_s22  ;;  %s669_s24 = int_to_ptr.vmem [resolvable:$true] %s56_s24 }
   0x5   :  { %s486_s27 = scalar_lea.hbm %s783_s1, 256 }
   0x6   :  { %p487_p0 = scmp.ne.s32.totalorder %s783_s1, %s486_s27  ;;  %p490_p1 = scmp.lt.u32.totalorder %s486_s27, %s783_s1 }
   0x8   :  { %p492_p2 = pnand %p490_p1, %p487_p0 }
   0xa   :  { %495 = shalt.err (!%p492_p2)
}
   0xb   :  { %s496_s8 = scalar_lea.vmem %s33_s22, 256  ;;  %p501_p4 = scmp.lt.s32.totalorder %s33_s22, %s33_s22 }
   0xc   :  { %p497_p3 = scmp.ne.s32.totalorder %s33_s22, %s496_s8  ;;  %p502_p5 = scmp.lt.s32.totalorder %s496_s8, %s496_s8 }
   0xe   :  { %p503_p6 = por %p502_p5, %p501_p4 }
  0x10   :  { %p504_p7 = pnand %p503_p6, %p497_p3 }
  0x12   :  { %507 = shalt.err (!%p504_p7)
}
  0x13   :  { %s628_s9 = smov 128   ;;  %s629_s10 = smov 8  }
  0x14   :  { %38 = dma.hbm_to_vmem [thread:$0]  %s783_s1, 256, %s33_s22, [#allocation6], %s628_s9, %s628_s9, %s629_s10  }
  0x15   :  { %s508_s15 = scalar_lea.hbm %s785_s3, 512 }
  0x16   :  { %p509_p8 = scmp.ne.s32.totalorder %s785_s3, %s508_s15  ;;  %p512_p9 = scmp.lt.u32.totalorder %s508_s15, %s785_s3 }
  0x18   :  { %p514_p10 = pnand %p512_p9, %p509_p8 }
  0x1a   :  { %517 = shalt.err (!%p514_p10)
}
  0x1b   :  { %s518_s20 = scalar_lea.vmem %s669_s24, 512  ;;  %p523_p12 = scmp.lt.s32.totalorder %s669_s24, %s669_s24 }
  0x1c   :  { %p519_p11 = scmp.ne.s32.totalorder %s669_s24, %s518_s20  ;;  %p524_p13 = scmp.lt.s32.totalorder %s518_s20, %s518_s20 }
  0x1e   :  { %p525_p0 = por %p524_p13, %p523_p12 }
  0x20   :  { %p526_p1 = pnand %p525_p0, %p519_p11 }
  0x22   :  { %529 = shalt.err (!%p526_p1)
}
  0x23   :  { %62 = dma.hbm_to_vmem [thread:$0]  %s785_s3, 512, %s669_s24, [#allocation9], %s628_s9, %s628_s9, %s629_s10  }
  0x24   :  { %s630_s22 = smov [#allocation2]   ;;  %s631_s25 = smov [#allocation7]  }
  0x25   :  { %s20_s23 = sshll.u32 %s630_s22, 4  ;;  %s44_s26 = sshll.u32 %s631_s25, 4  ;;  %s21_s23 = int_to_ptr.vmem [resolvable:$true] %s20_s23  ;;  %s706_s26 = int_to_ptr.vmem [resolvable:$true] %s44_s26 }
  0x26   :  { %s530_s29 = scalar_lea.hbm %s782_s0, 256 }
  0x27   :  { %p531_p2 = scmp.ne.s32.totalorder %s782_s0, %s530_s29  ;;  %p534_p3 = scmp.lt.u32.totalorder %s530_s29, %s782_s0 }
  0x29   :  { %p536_p4 = pnand %p534_p3, %p531_p2 }
  0x2b   :  { %539 = shalt.err (!%p536_p4)
}
  0x2c   :  { %s540_s3 = scalar_lea.vmem %s21_s23, 256  ;;  %p545_p6 = scmp.lt.s32.totalorder %s21_s23, %s21_s23 }
  0x2d   :  { %p541_p5 = scmp.ne.s32.totalorder %s21_s23, %s540_s3  ;;  %p546_p7 = scmp.lt.s32.totalorder %s540_s3, %s540_s3 }
  0x2f   :  { %p547_p8 = por %p546_p7, %p545_p6 }
  0x31   :  { %p548_p9 = pnand %p547_p8, %p541_p5 }
  0x33   :  { %551 = shalt.err (!%p548_p9)
}
  0x34   :  { %26 = dma.hbm_to_vmem [thread:$0]  %s782_s0, 256, %s21_s23, [#allocation3], %s628_s9, %s628_s9, %s629_s10  }
  0x35   :  { %s552_s15 = scalar_lea.hbm %s784_s2, 512 }
  0x36   :  { %p553_p10 = scmp.ne.s32.totalorder %s784_s2, %s552_s15  ;;  %p556_p11 = scmp.lt.u32.totalorder %s552_s15, %s784_s2 }
  0x38   :  { %p558_p12 = pnand %p556_p11, %p553_p10 }
  0x3a   :  { %561 = shalt.err (!%p558_p12)
}
  0x3b   :  { %s562_s20 = scalar_lea.vmem %s706_s26, 512  ;;  %p567_p0 = scmp.lt.s32.totalorder %s706_s26, %s706_s26 }
  0x3c   :  { %p563_p13 = scmp.ne.s32.totalorder %s706_s26, %s562_s20  ;;  %p568_p1 = scmp.lt.s32.totalorder %s562_s20, %s562_s20 }
  0x3e   :  { %p569_p2 = por %p568_p1, %p567_p0 }
  0x40   :  { %p570_p3 = pnand %p569_p2, %p563_p13 }
  0x42   :  { %573 = shalt.err (!%p570_p3)
}
  0x43   :  { %50 = dma.hbm_to_vmem [thread:$0]  %s784_s2, 512, %s706_s26, [#allocation6], %s628_s9, %s628_s9, %s629_s10  }
  0x44   :  { %s632_s21 = smov [#allocation10]   ;;  %s574_s27 = scalar_lea.hbm %s786_s4, 512 }
  0x45   :  { %s68_s22 = sshll.u32 %s632_s21, 4  ;;  %p575_p4 = scmp.ne.s32.totalorder %s786_s4, %s574_s27  ;;  %s69_s22 = int_to_ptr.vmem [resolvable:$true] %s68_s22 }
  0x46   :  { %p578_p5 = scmp.lt.u32.totalorder %s574_s27, %s786_s4 }
  0x48   :  { %p580_p6 = pnand %p578_p5, %p575_p4 }
  0x4a   :  { %583 = shalt.err (!%p580_p6)
}
  0x4b   :  { %s584_s8 = scalar_lea.vmem %s69_s22, 512  ;;  %p589_p8 = scmp.lt.s32.totalorder %s69_s22, %s69_s22 }
  0x4c   :  { %p585_p7 = scmp.ne.s32.totalorder %s69_s22, %s584_s8  ;;  %p590_p9 = scmp.lt.s32.totalorder %s584_s8, %s584_s8 }
  0x4e   :  { %p591_p10 = por %p590_p9, %p589_p8 }
  0x50   :  { %p592_p11 = pnand %p591_p10, %p585_p7 }
  0x52   :  { %595 = shalt.err (!%p592_p11)
}
  0x53   :  { %74 = dma.hbm_to_vmem [thread:$0]  %s786_s4, 512, %s69_s22, [#allocation9], %s628_s9, %s628_s9, %s629_s10  }
  0x54   :  { %618 = dma.done.wait [#allocation3], 256  }
  0x55   :  { %619 = vsyncadd [#allocation3], 4294967040 }
  0x56   :  { %620 = dma.done.wait [#allocation6], 768  }
  0x57   :  { %621 = vsyncadd [#allocation6], 4294966528 }
  0x58   :  { %622 = dma.done.wait [#allocation9], 1024  }
  0x59   :  { %623 = vsyncadd [#allocation9], 4294966272  ;;  %vm104_vm0 = vcmask 261120   ;;  %v96_v0 = vld [vmem:[#allocation7] sm:$0xff]  ;;  %v97_v1 = vld [vmem:[#allocation7 + $0x8] sm:$0xff]  ;;  %s633_s3 = smov [#allocation11]  }
  0x5a   :  { %v98_v2 = vld [vmem:[#allocation7 + $0x10] sm:$0xff]  ;;  %v454_v3 = vpack.c.bf16 %v97_v1, %v96_v0  ;;  %v99_v4 = vld [vmem:[#allocation7 + $0x18] sm:$0xff]  ;;  %v92_v5 = vld [vmem:[#allocation2] sm:$0xff]  ;;  %s374_s24 = sshll.u32 %s633_s3, 4  ;;  %s375_s24 = int_to_ptr.vmem [resolvable:$true] %s374_s24 }
  0x5b   :  { %v100_v6 = vld [vmem:[#allocation8] sm:$0xff]  ;;  %v458_v7 = vpack.c.bf16 %v99_v4, %v98_v2  ;;  %432 = vmatprep.mubr.msk.f32.mxu0 %vm104_vm0, %v92_v5  ;;  %v101_v8 = vld [vmem:[#allocation8 + $0x8] sm:$0xff]  ;;  %v102_v12 = vld [vmem:[#allocation8 + $0x10] sm:$0xff]  ;;  %s596_s12 = scalar_lea.vmem %s375_s24, 256  ;;  %p601_p13 = scmp.lt.s32.totalorder %s375_s24, %s375_s24 }
  0x5c   :  { %v269_v9 = vld [vmem:[#allocation10] sm:$0xff]  ;;  %455 = vmatprep.subr.bf16.mxu0 %v454_v3  ;;  %v446_v10 = vpack.c.bf16 %v101_v8, %v100_v6  ;;  %v270_v11 = vld [vmem:[#allocation10 + $0x8] sm:$0xff]  ;;  %v103_v13 = vld [vmem:[#allocation8 + $0x18] sm:$0xff]  ;;  %p597_p12 = scmp.ne.s32.totalorder %s375_s24, %s596_s12  ;;  %p602_p0 = scmp.lt.s32.totalorder %s596_s12, %s596_s12 }
  0x5d   :  { %457 = vmatpush3.bf16.msra.mxu0 %v454_v3  ;;  %v450_v14 = vpack.c.bf16 %v103_v13, %v102_v12  ;;  %v94_v15 = vld [vmem:[#allocation5] sm:$0xff]  ;;  %v462_v16 = vpack.c.bf16 %v270_v11, %v269_v9  ;;  %v272_v18 = vld [vmem:[#allocation10 + $0x18] sm:$0xff]  ;;  %v93_v19 = vld [vmem:[#allocation2 + $0x8] sm:$0xff] }
  0x5e   :  { %459 = vmatprep.subr.bf16.mxu0 %v458_v7  ;;  %447 = vmatprep.subr.bf16.mxu1 %v446_v10  ;;  %v271_v17 = vld [vmem:[#allocation10 + $0x10] sm:$0xff]  ;;  %v267_v20 = vmul.f32 %v94_v15, %v92_v5  ;;  %v95_v22 = vld [vmem:[#allocation5 + $0x8] sm:$0xff]  ;;  %v394_v27 = vld [vmem:[%s787_s5] ss:$0 sm:$0xff]  ;;  %p603_p1 = por %p602_p0, %p601_p13 }
  0x5f   :  { %449 = vmatpush3.bf16.msra.mxu1 %v446_v10  ;;  %421 = vmatprep.mubr.msk.f32.mxu1 %vm104_vm0, %v94_v15  ;;  %v466_v21 = vpack.c.bf16 %v272_v18, %v271_v17  ;;  %v268_v23 = vmul.f32 %v95_v22, %v93_v19 }
  0x60   :  { %451 = vmatprep.subr.bf16.mxu1 %v450_v14  ;;  %p604_p2 = pnand %p603_p1, %p597_p12 }
  0x61   :  { %461 = vmatpush3.bf16.msra.mxu0 %v458_v7 }
  0x62   :  { %463 = vmatprep.subr.bf16.mxu0 %v462_v16 }
  0x63   :  { %453 = vmatpush3.bf16.msra.mxu1 %v450_v14 }
  0x64   :  { %433 = vmatmul.mubr.msk.f32.vlgmr.msra.gmra.mrb[0].mxu0 %vm104_vm0, %v93_v19 }
  0x65   :  { %465 = vmatpush3.bf16.msra.mxu0 %v462_v16  ;;  %443 = vmatprep.mubr.msk.f32.mxu0 %vm104_vm0, %v267_v20 }
  0x66   :  { %467 = vmatprep.subr.bf16.mxu0 %v466_v21  ;;  %422 = vmatmul.mubr.msk.f32.vlgmr.msra.gmra.mrb[0].mxu1 %vm104_vm0, %v95_v22 }
  0x69   :  { %469 = vmatpush3.bf16.msra.mxu0 %v466_v21 }
  0x6c   :  { %444 = vmatmul.mubr.msk.f32.vlgmr.msra.gmra.mrb[0].mxu0 %vm104_vm0, %v268_v23 }
 0x139   :  { %v423_v24 = vpop.f32.mrb[0].mxu1 }
 0x13a   :  { %v177_v25 = vpop.f32.mrb[1].mxu1 }
 0x13f   :  { %v445_v26 = vpop.f32.mrb[0].mxu0 }
 0x140   :  { %v470_v28 = vadd.f32 %v445_v26, %v423_v24  ;;  %v345_v29 = vpop.f32.mrb[1].mxu0 }
 0x141   :  { %v471_v30 = vadd.f32 %v345_v29, %v177_v25 }
 0x142   :  { %v364_v31 = vadd.f32 %v470_v28, %v394_v27 }
 0x143   :  { %v363_v32 = vadd.f32 %v471_v30, %v394_v27 }
 0x144   :  { %482 = vtanh.f32 %v364_v31 }
 0x145   :  { %484 = vtanh.f32 %v363_v32 }
 0x14e   :  { %v483_v33 = vpop.eup %482 }
 0x14f   :  { %v485_v34 = vpop.eup %484  ;;  %368 = vst [vmem:[#allocation11 + $0x8] sm:$0xff] %v483_v33 }
 0x150   :  { %367 = vst [vmem:[#allocation11] sm:$0xff] %v485_v34 }
 0x151   :  { %607 = shalt.err (!%p604_p2)
}
 0x152   :  { %s608_s14 = scalar_lea.hbm %s788_s6, 256 }
 0x153   :  { %p609_p3 = scmp.ne.s32.totalorder %s788_s6, %s608_s14  ;;  %p612_p4 = scmp.lt.u32.totalorder %s608_s14, %s788_s6 }
 0x155   :  { %p614_p5 = pnand %p612_p4, %p609_p3 }
 0x157   :  { %617 = shalt.err (!%p614_p5)
}
 0x158   :  { %380 = dma.vmem_to_hbm [thread:$0]  %s375_s24, 256, %s788_s6, [#allocation4], %s628_s9, %s628_s9, %s629_s10  }
 0x159   :  { %624 = dma.done.wait [#allocation4], 256  }
 0x15a   :  { %625 = vsyncadd [#allocation4], 4294967040 }
 0x15b   :  { %384 = vsyncpa [#allocation3], 1 }
 0x15c   :  { %385 = vsyncpa [#allocation6], 1 }
 0x15d   :  { %386 = vsyncpa [#allocation9], 1 }
 0x15e   :  { %387 = vsyncpa [#allocation4], 1 }

</bundles_post_ra>
